<compile_context>
chip_gen: v7x
topology: tpu7x:2x2x1
jax: 0.10.0
libtpu: 0.0.40
codegen_flags: <defaults>
</compile_context>

<pallas_src>
import functools

import jax
import jax.numpy as jnp
from jax import lax
from jax.experimental import pallas as pl
from jax.experimental.pallas import tpu as pltpu


_PAD_ID = -(2 ** 31)        # sentinel lib_id for padded columns (never matches a real id)
_FUSED_MAX_B = 256          # batches up to this size use the single-tile fused kernel


def _round_up(x, m):
    return ((x + m - 1) // m) * m


# --------------------- prologue: L2 normalize -> bf16 keys + (1/temp)-scaled queries ----------
def _normalize_kernel(x_ref, k_ref, q_ref, *, inv_temp):
    x = x_ref[...].astype(jnp.float32)                               # (ptm, D)
    inv = lax.rsqrt(jnp.maximum(jnp.sum(x * x, axis=1, keepdims=True),
                                jnp.float32(1e-24)))                 # == 1 / max(||x||, 1e-12)
    xn = x * inv
    k_ref[...] = xn.astype(jnp.bfloat16)                             # keys: unit rows
    q_ref[...] = (xn * jnp.float32(inv_temp)).astype(jnp.bfloat16)   # queries: pre-scaled rows


# ----------------------------- main tiled NT-Xent kernel (online LSE) --------------------------
def _ntxent_tile_kernel(q_ref, k_ref, idr_ref, idc_ref, cb_ref, out_ref,
                        m_scr, l_scr, s_scr, c_scr, *, tm, tk, has_pad):
    i = pl.program_id(0)       # row tile  ("parallel")
    kstep = pl.program_id(1)   # col tile  ("arbitrary", reduction axis)

    @pl.when(kstep == 0)
    def _init():
        m_scr[...] = jnp.full_like(m_scr, -1e30)
        l_scr[...] = jnp.zeros_like(l_scr)
        s_scr[...] = jnp.zeros_like(s_scr)
        c_scr[...] = jnp.zeros_like(c_scr)

    # Similarity tile: queries already carry the 1/temperature scale. Contracting both
    # minor dims is the canonical flash-attention q.k^T form (no per-step transpose).
    s = lax.dot_general(q_ref[...], k_ref[...],
                        dimension_numbers=(((1,), (1,)), ((), ())),
                        preferred_element_type=jnp.float32)          # (tm, tk) f32
    if has_pad:
        # One broadcast add replaces the per-step iota/compare/or/select padding mask.
        s = s + cb_ref[...]                                          # -1e30 on padded cols

    # Positives mask as f32; padded columns never match (sentinel id).
    same_f = (idr_ref[...] == idc_ref[...]).astype(jnp.float32)

    # Online log-sum-exp (the max may include the diagonal term; that is only a shift).
    m_prev = m_scr[...]
    m_new = jnp.maximum(m_prev, jnp.max(s, axis=1, keepdims=True))
    alpha = jnp.exp(m_prev - m_new)
    p = jnp.exp(s - m_new)                                           # padded cols -> exactly 0

    l_scr[...] = alpha * l_scr[...] + jnp.sum(p, axis=1, keepdims=True)
    s_scr[...] = s_scr[...] + jnp.sum(s * same_f, axis=1, keepdims=True)
    c_scr[...] = c_scr[...] + jnp.sum(same_f, axis=1, keepdims=True)
    m_scr[...] = m_new

    # Self-pair removal: with tm == tk the diagonal can only live in col tile `i`, so the
    # full-tile iota/mask work runs on exactly one step per row tile and is skipped elsewhere.
    @pl.when(i == kstep)
    def _remove_diag():
        dm = (lax.broadcasted_iota(jnp.int32, (tm, tk), 0) ==
              lax.broadcasted_iota(jnp.int32, (tm, tk), 1)).astype(jnp.float32)
        l_scr[...] = l_scr[...] - jnp.sum(p * dm, axis=1, keepdims=True)   # drop exp(s_ii - m)
        s_scr[...] = s_scr[...] - jnp.sum(s * dm, axis=1, keepdims=True)   # drop s_ii
        c_scr[...] = c_scr[...] - jnp.float32(1.0)                         # drop the self "positive"

    @pl.when(kstep == pl.num_programs(1) - 1)
    def _finalize():
        c = c_scr[...]
        lse = m_scr[...] + jnp.log(l_scr[...])
        # loss_i = sum_{j positive} (lse_i - sim_ij) = c_i * lse_i - sum_pos sim_ij.
        # Rows with no positives (and the B == 1 edge case) contribute exactly 0.
        out_ref[...] = jnp.where(c > 0.5, c * lse - s_scr[...], jnp.float32(0.0))


# ------------------------------ fused single-tile kernel (small B) -----------------------------
def _ntxent_small_kernel(x_ref, idr_ref, idc_ref, out_ref, *, inv_temp, b_actual):
    n = x_ref.shape[0]
    x = x_ref[...].astype(jnp.float32)
    inv = lax.rsqrt(jnp.maximum(jnp.sum(x * x, axis=1, keepdims=True), jnp.float32(1e-24)))
    xn = x * inv
    s = lax.dot_general(xn, xn, dimension_numbers=(((1,), (1,)), ((), ())),
                        preferred_element_type=jnp.float32) * jnp.float32(inv_temp)
    row_g = lax.broadcasted_iota(jnp.int32, (n, n), 0)
    col_g = lax.broadcasted_iota(jnp.int32, (n, n), 1)
    excluded = (row_g == col_g) | (col_g >= b_actual)                 # self pair + padding
    same_f = jnp.where((idr_ref[...] == idc_ref[...]) & jnp.logical_not(excluded),
                       jnp.float32(1.0), jnp.float32(0.0))
    s_valid = jnp.where(excluded, jnp.float32(-1e30), s)
    m = jnp.max(s_valid, axis=1, keepdims=True)
    l = jnp.sum(jnp.exp(s_valid - m), axis=1, keepdims=True)
    lse = m + jnp.log(l)
    c = jnp.sum(same_f, axis=1, keepdims=True)
    pos = jnp.sum(s * same_f, axis=1, keepdims=True)
    out_ref[...] = jnp.where(c > 0.5, c * lse - pos, jnp.float32(0.0))


# ------------------------------------------ wrappers --------------------------------------------
def _choose_tiles(b, d):
    t = 512 if b >= 1024 else 256
    # Keep double-buffered bf16 q/k blocks plus the f32 (t, t) intermediates comfortably
    # under the 32 MiB scoped-VMEM limit (v7x has only 64 MiB physical VMEM).
    while t > 256 and (2 * 2 * 2 * t * d + 8 * 4 * t * t) > 24 * 1024 * 1024:
        t //= 2
    return t, _round_up(b, t)


def _ntxent_small(features, lib_ids, temperature):
    B, D = features.shape
    bp = _round_up(max(B, 1), 8)
    x = features.astype(jnp.float32)
    ids = lib_ids.astype(jnp.int32)
    if bp != B:
        x = jnp.pad(x, ((0, bp - B), (0, 0)))
        ids = jnp.pad(ids, (0, bp - B), constant_values=_PAD_ID)
    per_row = pl.pallas_call(
        functools.partial(_ntxent_small_kernel,
                          inv_temp=1.0 / float(temperature), b_actual=B),
        out_shape=jax.ShapeDtypeStruct((bp, 1), jnp.float32),
    )(x, ids.reshape(bp, 1), ids.reshape(1, bp))
    return jnp.sum(per_row[:B, 0]) / jnp.float32(B)


def _ntxent_tiled(features, lib_ids, temperature):
    B, D = features.shape
    tm, bp = _choose_tiles(B, D)
    tk = tm                                   # square tiles: single diag tile per row tile,
    has_pad = bp != B                         # padding only to one tile boundary

    x = features.astype(jnp.float32)
    ids = lib_ids.astype(jnp.int32)
    if has_pad:
        x = jnp.pad(x, ((0, bp - B), (0, 0)))
        ids = jnp.pad(ids, (0, bp - B), constant_values=_PAD_ID)
    ids_row = ids.reshape(bp, 1)
    ids_col = ids.reshape(1, bp)
    col_bias = jnp.where(jnp.arange(bp) < B, 0.0, -1e30).astype(jnp.float32).reshape(1, bp)

    # Normalize once; emit bf16 keys and 1/temperature-pre-scaled bf16 queries.
    ptm = 128 if D > 4096 else 256            # bp is a multiple of 256, hence of ptm
    kn, qn = pl.pallas_call(
        functools.partial(_normalize_kernel, inv_temp=1.0 / float(temperature)),
        out_shape=(jax.ShapeDtypeStruct((bp, D), jnp.bfloat16),
                   jax.ShapeDtypeStruct((bp, D), jnp.bfloat16)),
        grid=(bp // ptm,),
        in_specs=[pl.BlockSpec((ptm, D), lambda i: (i, 0))],
        out_specs=(pl.BlockSpec((ptm, D), lambda i: (i, 0)),
                   pl.BlockSpec((ptm, D), lambda i: (i, 0))),
        compiler_params=pltpu.CompilerParams(dimension_semantics=("parallel",)),
    )(x)

    kernel = functools.partial(_ntxent_tile_kernel, tm=tm, tk=tk, has_pad=has_pad)
    # NOTE: if profiling shows the cross-lane (XLU) reductions saturating, switch the four
    # (tm, 1) accumulators to lane-blocked (tm, 128) partials with an epilogue combine.
    # NOTE: on v7x, if xprof shows only one TensorCore busy, switch axis 0 to
    # pltpu.CORE_PARALLEL (bp // tm is even for all tile choices here).
    per_row = pl.pallas_call(
        kernel,
        out_shape=jax.ShapeDtypeStruct((bp, 1), jnp.float32),
        grid_spec=pltpu.PrefetchScalarGridSpec(
            num_scalar_prefetch=0,
            grid=(bp // tm, bp // tk),
            in_specs=[
                pl.BlockSpec((tm, D), lambda i, k: (i, 0)),   # queries (bf16, 1/temp folded)
                pl.BlockSpec((tk, D), lambda i, k: (k, 0)),   # keys    (bf16, streamed)
                pl.BlockSpec((tm, 1), lambda i, k: (i, 0)),   # lib_ids row view
                pl.BlockSpec((1, tk), lambda i, k: (0, k)),   # lib_ids col view
                pl.BlockSpec((1, tk), lambda i, k: (0, k)),   # padded-column bias
            ],
            out_specs=pl.BlockSpec((tm, 1), lambda i, k: (i, 0)),
            scratch_shapes=[pltpu.VMEM((tm, 1), jnp.float32)] * 4,  # m, l, pos-sim, pos-count
        ),
        compiler_params=pltpu.CompilerParams(
            dimension_semantics=("parallel", "arbitrary"),
            vmem_limit_bytes=32 * 1024 * 1024,
        ),
    )(qn, kn, ids_row, ids_col, col_bias)

    return jnp.sum(per_row[:B, 0]) / jnp.float32(B)


def ntxent_loss(features, lib_ids, temperature=0.5):
    """features: [B, D] float, lib_ids: [B] int -> scalar f32 NT-Xent loss."""
    B, _ = features.shape
    if B <= _FUSED_MAX_B:
        return _ntxent_small(features, lib_ids, temperature)
    return _ntxent_tiled(features, lib_ids, temperature)


# ------------------------------------ pure-JAX reference ---------------------------------------
def _ntxent_reference(features, lib_ids, temperature=0.5):
    """Faithful f32 mirror of the PyTorch module (for verification)."""
    x = features.astype(jnp.float32)
    n = jnp.maximum(jnp.linalg.norm(x, axis=1, keepdims=True), 1e-12)
    xn = x / n
    sim = (xn @ xn.T) / temperature
    labels = (lib_ids[:, None] == lib_ids[None, :]).astype(jnp.float32)
    B = labels.shape[0]
    offdiag = ~jnp.eye(B, dtype=bool)
    labels_nd = labels[offdiag].reshape(B, B - 1)
    sim_nd = sim[offdiag].reshape(B, B - 1)
    logp = jax.nn.log_softmax(sim_nd, axis=1)
    loss = -jnp.sum(labels_nd * logp)
    return loss / B


if __name__ == "__main__":
    key = jax.random.PRNGKey(0)
    k1, k2, k3, k4 = jax.random.split(key, 4)

    # small shape consistent with the module: batch=8, feature_dim=32 (fused f32 path)
    B, D = 8, 32
    features = jax.random.normal(k1, (B, D), dtype=jnp.float32)
    lib_ids = jax.random.randint(k2, (B,), 0, 3, dtype=jnp.int32)
    loss = jax.block_until_ready(ntxent_loss(features, lib_ids, temperature=0.5))
    ref = jax.block_until_ready(_ntxent_reference(features, lib_ids, temperature=0.5))
    assert jnp.allclose(loss, ref, rtol=3e-2, atol=3e-2), (loss, ref)

    # larger check: exercises tiling, batch padding, the diag-tile correction and the
    # multi-step online log-sum-exp (bf16 MXU operands -> loosened tolerance)
    B2, D2 = 300, 64
    features2 = jax.random.normal(k3, (B2, D2), dtype=jnp.float32)
    lib_ids2 = jax.random.randint(k4, (B2,), 0, 5, dtype=jnp.int32)
    loss2 = jax.block_until_ready(ntxent_loss(features2, lib_ids2, temperature=0.5))
    ref2 = jax.block_until_ready(_ntxent_reference(features2, lib_ids2, temperature=0.5))
    assert jnp.allclose(loss2, ref2, rtol=3e-2, atol=3e-2), (loss2, ref2)

    print("KERNEL_OK")
</pallas_src>

<mosaic_0001>
module attributes {stable_mosaic.version = 11 : i64} {
  func.func @_ntxent_small_kernel(%arg0: memref<8x32xf32, #tpu.memory_space<vmem>>, %arg1: memref<8x1xi32, #tpu.memory_space<vmem>>, %arg2: memref<1x8xi32, #tpu.memory_space<vmem>>, %arg3: memref<8x1xf32, #tpu.memory_space<vmem>>) attributes {dimension_semantics = [], scalar_prefetch = 0 : i64, scratch_operands = 0 : i64, tpu.core_type = #tpu.core_type<tc>} {
    %c0 = arith.constant 0 : index
    %c0_0 = arith.constant 0 : index
    %0 = vector.load %arg0[%c0, %c0_0] : memref<8x32xf32, #tpu.memory_space<vmem>>, vector<8x32xf32>
    %1 = arith.mulf %0, %0 : vector<8x32xf32>
    %cst = arith.constant dense<0.000000e+00> : vector<8xf32>
    %2 = vector.multi_reduction <add>, %1, %cst [1] : vector<8x32xf32> to vector<8xf32>
    %3 = vector.shape_cast %2 : vector<8xf32> to vector<8x1xf32>
    %cst_1 = arith.constant 1.000000e-24 : f32
    %4 = vector.broadcast %cst_1 : f32 to vector<8x1xf32>
    %5 = arith.maximumf %3, %4 : vector<8x1xf32>
    %6 = math.rsqrt %5 : vector<8x1xf32>
    %7 = vector.broadcast %6 : vector<8x1xf32> to vector<8x32xf32>
    %8 = arith.mulf %0, %7 : vector<8x32xf32>
    %cst_2 = arith.constant dense<0.000000e+00> : vector<8x8xf32>
    %9 = tpu.matmul %8, %8, %cst_2 {dimension_numbers = #tpu.dot_dimension_numbers<[1], [1], [0], [0], [0, 0, 1, 0], [], []>} : vector<8x32xf32>, vector<8x32xf32>, vector<8x8xf32> -> vector<8x8xf32>
    %cst_3 = arith.constant 2.000000e+00 : f32
    %10 = vector.broadcast %cst_3 : f32 to vector<8x8xf32>
    %11 = arith.mulf %9, %10 : vector<8x8xf32>
    %12 = tpu.iota {dimensions = array<i32: 0>} : vector<8x8xi32>
    %13 = tpu.iota {dimensions = array<i32: 1>} : vector<8x8xi32>
    %14 = arith.cmpi eq, %12, %13 : vector<8x8xi32>
    %c8_i32 = arith.constant 8 : i32
    %15 = vector.broadcast %c8_i32 : i32 to vector<8x8xi32>
    %16 = arith.cmpi sge, %13, %15 : vector<8x8xi32>
    %17 = arith.ori %14, %16 : vector<8x8xi1>
    %c0_4 = arith.constant 0 : index
    %c0_5 = arith.constant 0 : index
    %18 = vector.load %arg1[%c0_4, %c0_5] : memref<8x1xi32, #tpu.memory_space<vmem>>, vector<8x1xi32>
    %c0_6 = arith.constant 0 : index
    %c0_7 = arith.constant 0 : index
    %19 = vector.load %arg2[%c0_6, %c0_7] : memref<1x8xi32, #tpu.memory_space<vmem>>, vector<1x8xi32>
    %20 = vector.broadcast %18 : vector<8x1xi32> to vector<8x8xi32>
    %21 = vector.broadcast %19 : vector<1x8xi32> to vector<8x8xi32>
    %22 = arith.cmpi eq, %20, %21 : vector<8x8xi32>
    %cst_8 = arith.constant dense<true> : vector<8x8xi1>
    %23 = arith.xori %17, %cst_8 : vector<8x8xi1>
    %24 = arith.andi %22, %23 : vector<8x8xi1>
    %cst_9 = arith.constant 1.000000e+00 : f32
    %cst_10 = arith.constant 0.000000e+00 : f32
    %25 = vector.broadcast %cst_9 : f32 to vector<8x8xf32>
    %26 = vector.broadcast %cst_10 : f32 to vector<8x8xf32>
    %27 = arith.select %24, %25, %26 : vector<8x8xi1>, vector<8x8xf32>
    %cst_11 = arith.constant -1.000000e+30 : f32
    %28 = vector.broadcast %cst_11 : f32 to vector<8x8xf32>
    %29 = arith.select %17, %28, %11 : vector<8x8xi1>, vector<8x8xf32>
    %cst_12 = arith.constant dense<0xFF800000> : vector<8xf32>
    %30 = vector.multi_reduction <maximumf>, %29, %cst_12 [1] : vector<8x8xf32> to vector<8xf32>
    %31 = vector.shape_cast %30 : vector<8xf32> to vector<8x1xf32>
    %32 = vector.broadcast %31 : vector<8x1xf32> to vector<8x8xf32>
    %33 = arith.subf %29, %32 : vector<8x8xf32>
    %34 = math.exp %33 : vector<8x8xf32>
    %cst_13 = arith.constant dense<0.000000e+00> : vector<8xf32>
    %35 = vector.multi_reduction <add>, %34, %cst_13 [1] : vector<8x8xf32> to vector<8xf32>
    %36 = vector.shape_cast %35 : vector<8xf32> to vector<8x1xf32>
    %37 = math.log %36 : vector<8x1xf32>
    %38 = arith.addf %31, %37 : vector<8x1xf32>
    %cst_14 = arith.constant dense<0.000000e+00> : vector<8xf32>
    %39 = vector.multi_reduction <add>, %27, %cst_14 [1] : vector<8x8xf32> to vector<8xf32>
    %40 = vector.shape_cast %39 : vector<8xf32> to vector<8x1xf32>
    %41 = arith.mulf %11, %27 : vector<8x8xf32>
    %cst_15 = arith.constant dense<0.000000e+00> : vector<8xf32>
    %42 = vector.multi_reduction <add>, %41, %cst_15 [1] : vector<8x8xf32> to vector<8xf32>
    %43 = vector.shape_cast %42 : vector<8xf32> to vector<8x1xf32>
    %cst_16 = arith.constant 5.000000e-01 : f32
    %44 = vector.broadcast %cst_16 : f32 to vector<8x1xf32>
    %45 = arith.cmpf ogt, %40, %44 : vector<8x1xf32>
    %46 = arith.mulf %40, %38 : vector<8x1xf32>
    %47 = arith.subf %46, %43 : vector<8x1xf32>
    %cst_17 = arith.constant 0.000000e+00 : f32
    %48 = vector.broadcast %cst_17 : f32 to vector<8x1xf32>
    %49 = arith.select %45, %47, %48 : vector<8x1xi1>, vector<8x1xf32>
    %c0_18 = arith.constant 0 : index
    %c0_19 = arith.constant 0 : index
    %50 = vector.load %arg3[%c0_18, %c0_19] : memref<8x1xf32, #tpu.memory_space<vmem>>, vector<8x1xf32>
    tpu.vector_store %arg3[%c0_18, %c0_19], %49 {strides = array<i32>} : memref<8x1xf32, #tpu.memory_space<vmem>>, vector<8x1xf32>,
    return
  }
}

</mosaic_0001>

<bundles_post_ra>
// kernel: tpu_custom_call.1
= control target key start
LH: loop header
LB: loop body
LE: loop exit
PB: predicated region body
PF: predicated region fallthrough
CT: control target
= control target key end

     0   :  { %vm16_vm0 = vcmask 261120   ;;  %v170_v3 = vmov 0.0   ;;  %vm171_vm1 = vmmov 0   ;;  %v172_v4 = vmov 0   ;;  %s213_s0 = inlined_call_operand.vmem [shape: f32[8,32], index: 0, kind: input, shape index: {}]   ;;  %s214_s1 = inlined_call_operand.vmem [shape: s32[8,1], index: 1, kind: input, shape index: {}]   ;;  %s215_s2 = inlined_call_operand.vmem [shape: s32[1,8], index: 2, kind: input, shape index: {}]   ;;  %s216_s3 = inlined_call_operand.vmem [shape: f32[8,1], index: 3, kind: output, shape index: {}]  }
   0x1   :  { %v14_v0 = vld [vmem:[%s213_s0] sm:$0xff]  ;;  %153 = vmatprep.subr.mxu0 %v170_v3  ;;  %155 = vmatprep.mubr.msk.f32.mxu0 %vm171_vm1, %v170_v3  ;;  %v97_v10 = vlaneseq  ;;  %vm173_vm5 = vmmov 1   ;;  %vm118_vm8 = vcmask 64512   ;;  %vm142_vm10 = vcmask 7168  }
   0x2   :  { %v15_v1 = vmul.f32 %v14_v0, %v14_v0  ;;  %162 = vset.pattern.permute.xlu1 %v172_v4  ;;  %v104_v5 = vld [vmem:[%s214_s1] sm:$0xff]  ;;  %163 = vset.pattern.permute.xlu0 %v172_v4 }
   0x3   :  { %107 = vperm.xlu1 %162, %v104_v5   ;;  %v98_v11 = vshrl.u32 %v97_v10, 7  ;;  %v100_v12 = vand.u32 127, %v97_v10  ;;  %v150_v13 = vld [vmem:[%s215_s2] ss:$0 sm:$0xff] }
   0x4   :  { %v17_v2 = vsel %vm16_vm0, %v15_v1, 0.0 }
   0x5   :  { %18 = vadd.xlane.f32.xlu0 %v17_v2  ;;  %vm101_vm2 = vcmp.eq.s32.totalorder %v98_v11, %v100_v12  ;;  %vm102_vm3 = vcmp.ge.s32.totalorder %v100_v12, 8 }
   0x6   :  { %vm103_vm4 = vmor %vm101_vm2, %vm102_vm3 }
   0x7   :  { %vm114_vm6 = vmxor %vm103_vm4, %vm173_vm5 }
  0x82   :  { %v108_v14 = vpop.permute.xlu1 %107 }
  0x83   :  { %vm113_vm7 = vcmp.eq.s32.totalorder %v108_v14, %v150_v13 }
  0x84   :  { %vm115_vm9 = vmand %vm113_vm7, %vm114_vm6 }
  0x85   :  { %v116_v20 = vsel %vm115_vm9, 1.0, %v170_v3 }
  0x86   :  { %v131_v21 = vsel %vm118_vm8, %v116_v20, 0.0 }
  0x92   :  { %v19_v6 = vpop.xlane.xlu0 %18 }
  0x93   :  { %v20_v7 = vmax.f32 %v19_v6, 1e-24 }
  0x95   :  { %164 = vrsqrt.f32 %v20_v7 }
  0x9f   :  { %v165_v8 = vpop.eup %164 }
  0xa0   :  { %v22_v9 = vmul.f32 %v165_v8, %v14_v0 }
  0xa2   :  { %154 = vmatpush3.xpose.msk.msra.mxu0 %vm16_vm0, %v22_v9 }
  0xa5   :  { %156 = vmatmul.mubr.msk.f32.vlgmr.msra.gmra.mrb[0].mxu0 %vm16_vm0, %v22_v9 }
 0x178   :  { %v92_v15 = vpop.f32.mrb[0].mxu0 }
 0x179   :  { %v96_v16 = vmul.f32 2.0, %v92_v15  ;;  %v157_v17 = vpop.f32.mrb[1].mxu0 }
 0x17b   :  { %v117_v18 = vsel %vm103_vm4, -1e+30, %v96_v16  ;;  %v134_v22 = vmul.f32 %v116_v20, %v96_v16 }
 0x17c   :  { %v119_v19 = vsel %vm118_vm8, %v117_v18, -inf }
 0x17d   :  { %120 = vmax.xlane.f32.xlu0 %v119_v19  ;;  %v135_v23 = vsel %vm118_vm8, %v134_v22, 0.0 }
 0x181   :  { %132 = vadd.xlane.f32.xlu0 %v131_v21 }
 0x185   :  { %136 = vadd.xlane.f32.xlu0 %v135_v23 }
 0x20a   :  { %v121_v24 = vpop.xlane.xlu0 %120 }
 0x20b   :  { %v122_v25 = vsub.f32 %v117_v18, %v121_v24 }
 0x20d   :  { %v123_v26 = vmul.f32 1.442695, %v122_v25 }
 0x20e   :  { %v133_v31 = vpop.xlane.xlu0 %132 }
 0x20f   :  { %166 = vpow2.f32 %v123_v26  ;;  %vm138_vm11 = vcmp.gt.f32.partialorder %v133_v31, 0.5 }
 0x212   :  { %v137_v35 = vpop.xlane.xlu0 %136 }
 0x219   :  { %v167_v27 = vpop.eup %166 }
 0x21a   :  { %v125_v28 = vsel %vm118_vm8, %v167_v27, 0.0 }
 0x21b   :  { %126 = vadd.xlane.f32.xlu1 %v125_v28 }
 0x2a8   :  { %v127_v29 = vpop.xlane.xlu1 %126 }
 0x2a9   :  { %168 = vlog2.f32 %v127_v29 }
 0x2b3   :  { %v169_v30 = vpop.eup %168 }
 0x2b4   :  { %v129_v32 = vmul.f32 0.6931472, %v169_v30 }
 0x2b6   :  { %v130_v33 = vadd.f32 %v129_v32, %v121_v24 }
 0x2b8   :  { %v139_v34 = vmul.f32 %v133_v31, %v130_v33 }
 0x2ba   :  { %v140_v36 = vsub.f32 %v139_v34, %v137_v35 }
 0x2bc   :  { %v141_v37 = vsel %vm138_vm11, %v140_v36, 0.0 }
 0x2bd   :  { %143 = vst.msk [vmem:[%s216_s3] sm:$0xff] %vm142_vm10, %v141_v37 }

</bundles_post_ra>
